<compile_context>
chip_gen: v7x
topology: tpu7x:2x2x1
jax: 0.10.0
libtpu: 0.0.40
codegen_flags: <defaults>
</compile_context>

<pallas_src>
import functools

import jax
import jax.numpy as jnp
from jax.experimental import pallas as pl
from jax.experimental.pallas import tpu as pltpu

AMBIENT_DIM = 30
CODE_DIM = 20
NLIN = 4
H1 = 128
H2 = 64
MAX_TILE = 2048


def _ae_kernel(x_ref, w1, b1, w2, b2, wm, bm, w4, b4, w5, b5, o_ref):
    """Fused forward for one batch tile.  All operands live in VMEM.

    x_ref : [AMBIENT_DIM, T]   (feature-major; T = batch tile on lanes)
    w*    : [out, in] weights, b* : [out, 1] biases (broadcast over lanes)
    """
    x = x_ref[...]

    # encoder Linear(30,128) + ReLU
    h = jnp.dot(w1[...], x, preferred_element_type=jnp.float32) + b1[...]
    h = jnp.maximum(h, 0.0)
    # encoder Linear(128,64) + ReLU
    h = jnp.dot(w2[...], h, preferred_element_type=jnp.float32) + b2[...]
    h = jnp.maximum(h, 0.0)
    # folded affine chain: enc Linear(64,20) -> 4x Linear(20,20) -> dec
    # Linear(20,64) (no nonlinearity between them), then the decoder's ReLU
    h = jnp.dot(wm[...], h, preferred_element_type=jnp.float32) + bm[...]
    h = jnp.maximum(h, 0.0)
    # decoder Linear(64,128) + ReLU
    h = jnp.dot(w4[...], h, preferred_element_type=jnp.float32) + b4[...]
    h = jnp.maximum(h, 0.0)
    # decoder Linear(128,30)
    out = jnp.dot(w5[...], h, preferred_element_type=jnp.float32) + b5[...]

    o_ref[...] = out.astype(o_ref.dtype)


def _full_spec(shape):
    """Whole-array block, resident across all grid steps (weights / biases)."""
    return pl.BlockSpec(shape, lambda i: (0,) * len(shape))


def _pick_batch_tile(batch):
    """Largest lane-dense tile (multiple of 128, <= MAX_TILE) dividing `batch`,
    keeping >= 2 grid steps when possible (megacore sharding).  Small / odd
    batches fall back to a single full-batch step."""
    if batch % 128 != 0:
        return batch
    best = 128
    for t in range(128, min(batch, MAX_TILE) + 1, 128):
        if batch % t == 0 and batch // t >= 2:
            best = t
    if batch // best < 2:          # e.g. batch == 128
        best = batch
    return best


@functools.partial(jax.jit, static_argnames=("batch_tile",))
def autoencoder_forward(x, params, *, batch_tile=None):
    """x: [batch, AMBIENT_DIM] -> xhat: [batch, AMBIENT_DIM]."""
    B = x.shape[0]
    if batch_tile is None:
        batch_tile = _pick_batch_tile(B)
    assert B % batch_tile == 0, "batch must be divisible by batch_tile"

    (ew1, eb1, ew2, eb2, ew3, eb3, lw, lb,
     dw1, db1, dw2, db2, dw3, db3) = params

    # ---- exact affine fold of ew3 -> nlin linears -> dw1 (no nonlinearity
    # between them); a handful of tiny matmuls done once in the wrapper ----
    wm = ew3                      # (20, 64)
    bm = eb3                      # (20, 1)
    for i in range(NLIN):
        wm = lw[i] @ wm
        bm = lw[i] @ bm + lb[i]
    wm = dw1 @ wm                 # (64, 64)
    bm = dw1 @ bm + db1           # (64, 1)

    # feature-major layout for the kernel (batch on lanes)
    x_t = x.T                     # (AMBIENT_DIM, B)

    grid = (B // batch_tile,)

    in_specs = [
        pl.BlockSpec((AMBIENT_DIM, batch_tile), lambda i: (0, i)),   # x tile
        _full_spec(ew1.shape), _full_spec(eb1.shape),
        _full_spec(ew2.shape), _full_spec(eb2.shape),
        _full_spec(wm.shape), _full_spec(bm.shape),
        _full_spec(dw2.shape), _full_spec(db2.shape),
        _full_spec(dw3.shape), _full_spec(db3.shape),
    ]
    out_spec = pl.BlockSpec((AMBIENT_DIM, batch_tile), lambda i: (0, i))

    flops_per_row = 2 * (AMBIENT_DIM * H1 + H1 * H2 + H2 * H2
                         + H2 * H1 + H1 * AMBIENT_DIM)
    weight_bytes = 4 * (AMBIENT_DIM * H1 + H1 + H1 * H2 + H2 + H2 * H2 + H2
                        + H2 * H1 + H1 + H1 * AMBIENT_DIM + AMBIENT_DIM)
    cost = pl.CostEstimate(flops=flops_per_row * B,
                           transcendentals=0,
                           bytes_accessed=8 * B * AMBIENT_DIM + weight_bytes)

    out_t = pl.pallas_call(
        _ae_kernel,
        out_shape=jax.ShapeDtypeStruct((AMBIENT_DIM, B), x.dtype),
        grid_spec=pl.GridSpec(
            grid=grid,
            in_specs=in_specs,
            out_specs=out_spec,
        ),
        compiler_params=pltpu.CompilerParams(
            dimension_semantics=("parallel",)),
        cost_estimate=cost,
    )(x_t, ew1, eb1, ew2, eb2, wm, bm, dw2, db2, dw3, db3)

    return out_t.T


def init_params(key):
    """PyTorch nn.Linear default init (U(-k, k), k = 1/sqrt(fan_in)).

    Weights are stored in PyTorch layout (out_features, in_features);
    biases as (out_features, 1) columns (broadcast over the lane/batch dim).
    """
    def linear(k, fan_in, fan_out):
        kw, kb = jax.random.split(k)
        bound = 1.0 / jnp.sqrt(jnp.float32(fan_in))
        w = jax.random.uniform(kw, (fan_out, fan_in), jnp.float32, -bound, bound)
        b = jax.random.uniform(kb, (fan_out, 1), jnp.float32, -bound, bound)
        return w, b

    keys = jax.random.split(key, 6 + NLIN)
    ew1, eb1 = linear(keys[0], AMBIENT_DIM, H1)
    ew2, eb2 = linear(keys[1], H1, H2)
    ew3, eb3 = linear(keys[2], H2, CODE_DIM)

    lws, lbs = [], []
    for i in range(NLIN):
        w, b = linear(keys[3 + i], CODE_DIM, CODE_DIM)
        lws.append(w)
        lbs.append(b)
    lw = jnp.stack(lws, axis=0)            # (NLIN, CODE_DIM, CODE_DIM)
    lb = jnp.stack(lbs, axis=0)            # (NLIN, CODE_DIM, 1)

    dw1, db1 = linear(keys[3 + NLIN], CODE_DIM, H2)
    dw2, db2 = linear(keys[4 + NLIN], H2, H1)
    dw3, db3 = linear(keys[5 + NLIN], H1, AMBIENT_DIM)

    return (ew1, eb1, ew2, eb2, ew3, eb3, lw, lb,
            dw1, db1, dw2, db2, dw3, db3)


def reference_forward(x, params):
    """Pure-JAX reference, layer-by-layer (no folding) — same math as PyTorch."""
    (ew1, eb1, ew2, eb2, ew3, eb3, lw, lb,
     dw1, db1, dw2, db2, dw3, db3) = params
    h = jax.nn.relu(x @ ew1.T + eb1.T)
    h = jax.nn.relu(h @ ew2.T + eb2.T)
    code = h @ ew3.T + eb3.T
    for i in range(NLIN):
        code = code @ lw[i].T + lb[i].T
    h = jax.nn.relu(code @ dw1.T + db1.T)
    h = jax.nn.relu(h @ dw2.T + db2.T)
    return h @ dw3.T + db3.T


if __name__ == "__main__":
    key = jax.random.PRNGKey(0)
    k_param, k_x1, k_x2 = jax.random.split(key, 3)

    params = init_params(k_param)

    # Small-batch path (single grid step, block == full array dims).
    x_small = jax.random.normal(k_x1, (16, AMBIENT_DIM), jnp.float32)
    xhat_small = jax.block_until_ready(autoencoder_forward(x_small, params))
    ref_small = reference_forward(x_small, params)
    if not jnp.allclose(xhat_small, ref_small, atol=1e-4, rtol=1e-4):
        raise AssertionError("Pallas kernel output (small batch) != reference")

    # Lane-dense tiled path (batch=256 -> 2 grid steps of 128 lanes each).
    x_big = jax.random.normal(k_x2, (256, AMBIENT_DIM), jnp.float32)
    xhat_big = jax.block_until_ready(autoencoder_forward(x_big, params))
    ref_big = reference_forward(x_big, params)
    if not jnp.allclose(xhat_big, ref_big, atol=1e-4, rtol=1e-4):
        raise AssertionError("Pallas kernel output (tiled batch) != reference")

    print("KERNEL_OK")
</pallas_src>

<mosaic_0001>
module attributes {stable_mosaic.version = 11 : i64} {
  func.func @_ae_kernel(%arg0: i32, %arg1: memref<30x16xf32, #tpu.memory_space<vmem>>, %arg2: memref<128x30xf32, #tpu.memory_space<vmem>>, %arg3: memref<128x1xf32, #tpu.memory_space<vmem>>, %arg4: memref<64x128xf32, #tpu.memory_space<vmem>>, %arg5: memref<64x1xf32, #tpu.memory_space<vmem>>, %arg6: memref<64x64xf32, #tpu.memory_space<vmem>>, %arg7: memref<64x1xf32, #tpu.memory_space<vmem>>, %arg8: memref<128x64xf32, #tpu.memory_space<vmem>>, %arg9: memref<128x1xf32, #tpu.memory_space<vmem>>, %arg10: memref<30x128xf32, #tpu.memory_space<vmem>>, %arg11: memref<30x1xf32, #tpu.memory_space<vmem>>, %arg12: memref<30x16xf32, #tpu.memory_space<vmem>>) attributes {dimension_semantics = [#tpu.dimension_semantics<parallel>], iteration_bounds = array<i64: 1>, scalar_prefetch = 0 : i64, scratch_operands = 0 : i64, tpu.core_type = #tpu.core_type<tc>, window_params = [{transform_indices = @transform_0, window_bounds = array<i64: 30, 16>}, {pipeline_mode = #tpu.pipeline_mode<synchronous>, transform_indices = @transform_1, window_bounds = array<i64: 128, 30>}, {pipeline_mode = #tpu.pipeline_mode<synchronous>, transform_indices = @transform_2, window_bounds = array<i64: 128, 1>}, {pipeline_mode = #tpu.pipeline_mode<synchronous>, transform_indices = @transform_3, window_bounds = array<i64: 64, 128>}, {pipeline_mode = #tpu.pipeline_mode<synchronous>, transform_indices = @transform_4, window_bounds = array<i64: 64, 1>}, {pipeline_mode = #tpu.pipeline_mode<synchronous>, transform_indices = @transform_5, window_bounds = array<i64: 64, 64>}, {pipeline_mode = #tpu.pipeline_mode<synchronous>, transform_indices = @transform_6, window_bounds = array<i64: 64, 1>}, {pipeline_mode = #tpu.pipeline_mode<synchronous>, transform_indices = @transform_7, window_bounds = array<i64: 128, 64>}, {pipeline_mode = #tpu.pipeline_mode<synchronous>, transform_indices = @transform_8, window_bounds = array<i64: 128, 1>}, {pipeline_mode = #tpu.pipeline_mode<synchronous>, transform_indices = @transform_9, window_bounds = array<i64: 30, 128>}, {pipeline_mode = #tpu.pipeline_mode<synchronous>, transform_indices = @transform_10, window_bounds = array<i64: 30, 1>}, {transform_indices = @transform_11, window_bounds = array<i64: 30, 16>}]} {
    %c0 = arith.constant 0 : index
    %c0_0 = arith.constant 0 : index
    %0 = vector.load %arg1[%c0, %c0_0] : memref<30x16xf32, #tpu.memory_space<vmem>>, vector<30x16xf32>
    %c0_1 = arith.constant 0 : index
    %c0_2 = arith.constant 0 : index
    %1 = vector.load %arg2[%c0_1, %c0_2] : memref<128x30xf32, #tpu.memory_space<vmem>>, vector<128x30xf32>
    %cst = arith.constant dense<0.000000e+00> : vector<128x16xf32>
    %2 = tpu.matmul %1, %0, %cst {dimension_numbers = #tpu.dot_dimension_numbers<[1], [0], [0], [1], [0, 0, 1, 1], [], []>} : vector<128x30xf32>, vector<30x16xf32>, vector<128x16xf32> -> vector<128x16xf32>
    %c0_3 = arith.constant 0 : index
    %c0_4 = arith.constant 0 : index
    %3 = vector.load %arg3[%c0_3, %c0_4] : memref<128x1xf32, #tpu.memory_space<vmem>>, vector<128x1xf32>
    %4 = vector.broadcast %3 : vector<128x1xf32> to vector<128x16xf32>
    %5 = arith.addf %2, %4 : vector<128x16xf32>
    %cst_5 = arith.constant 0.000000e+00 : f32
    %6 = vector.broadcast %cst_5 : f32 to vector<128x16xf32>
    %7 = arith.maximumf %5, %6 : vector<128x16xf32>
    %c0_6 = arith.constant 0 : index
    %c0_7 = arith.constant 0 : index
    %8 = vector.load %arg4[%c0_6, %c0_7] : memref<64x128xf32, #tpu.memory_space<vmem>>, vector<64x128xf32>
    %cst_8 = arith.constant dense<0.000000e+00> : vector<64x16xf32>
    %9 = tpu.matmul %8, %7, %cst_8 {dimension_numbers = #tpu.dot_dimension_numbers<[1], [0], [0], [1], [0, 0, 1, 1], [], []>} : vector<64x128xf32>, vector<128x16xf32>, vector<64x16xf32> -> vector<64x16xf32>
    %c0_9 = arith.constant 0 : index
    %c0_10 = arith.constant 0 : index
    %10 = vector.load %arg5[%c0_9, %c0_10] : memref<64x1xf32, #tpu.memory_space<vmem>>, vector<64x1xf32>
    %11 = vector.broadcast %10 : vector<64x1xf32> to vector<64x16xf32>
    %12 = arith.addf %9, %11 : vector<64x16xf32>
    %cst_11 = arith.constant 0.000000e+00 : f32
    %13 = vector.broadcast %cst_11 : f32 to vector<64x16xf32>
    %14 = arith.maximumf %12, %13 : vector<64x16xf32>
    %c0_12 = arith.constant 0 : index
    %c0_13 = arith.constant 0 : index
    %15 = vector.load %arg6[%c0_12, %c0_13] : memref<64x64xf32, #tpu.memory_space<vmem>>, vector<64x64xf32>
    %cst_14 = arith.constant dense<0.000000e+00> : vector<64x16xf32>
    %16 = tpu.matmul %15, %14, %cst_14 {dimension_numbers = #tpu.dot_dimension_numbers<[1], [0], [0], [1], [0, 0, 1, 1], [], []>} : vector<64x64xf32>, vector<64x16xf32>, vector<64x16xf32> -> vector<64x16xf32>
    %c0_15 = arith.constant 0 : index
    %c0_16 = arith.constant 0 : index
    %17 = vector.load %arg7[%c0_15, %c0_16] : memref<64x1xf32, #tpu.memory_space<vmem>>, vector<64x1xf32>
    %18 = vector.broadcast %17 : vector<64x1xf32> to vector<64x16xf32>
    %19 = arith.addf %16, %18 : vector<64x16xf32>
    %cst_17 = arith.constant 0.000000e+00 : f32
    %20 = vector.broadcast %cst_17 : f32 to vector<64x16xf32>
    %21 = arith.maximumf %19, %20 : vector<64x16xf32>
    %c0_18 = arith.constant 0 : index
    %c0_19 = arith.constant 0 : index
    %22 = vector.load %arg8[%c0_18, %c0_19] : memref<128x64xf32, #tpu.memory_space<vmem>>, vector<128x64xf32>
    %cst_20 = arith.constant dense<0.000000e+00> : vector<128x16xf32>
    %23 = tpu.matmul %22, %21, %cst_20 {dimension_numbers = #tpu.dot_dimension_numbers<[1], [0], [0], [1], [0, 0, 1, 1], [], []>} : vector<128x64xf32>, vector<64x16xf32>, vector<128x16xf32> -> vector<128x16xf32>
    %c0_21 = arith.constant 0 : index
    %c0_22 = arith.constant 0 : index
    %24 = vector.load %arg9[%c0_21, %c0_22] : memref<128x1xf32, #tpu.memory_space<vmem>>, vector<128x1xf32>
    %25 = vector.broadcast %24 : vector<128x1xf32> to vector<128x16xf32>
    %26 = arith.addf %23, %25 : vector<128x16xf32>
    %cst_23 = arith.constant 0.000000e+00 : f32
    %27 = vector.broadcast %cst_23 : f32 to vector<128x16xf32>
    %28 = arith.maximumf %26, %27 : vector<128x16xf32>
    %c0_24 = arith.constant 0 : index
    %c0_25 = arith.constant 0 : index
    %29 = vector.load %arg10[%c0_24, %c0_25] : memref<30x128xf32, #tpu.memory_space<vmem>>, vector<30x128xf32>
    %cst_26 = arith.constant dense<0.000000e+00> : vector<30x16xf32>
    %30 = tpu.matmul %29, %28, %cst_26 {dimension_numbers = #tpu.dot_dimension_numbers<[1], [0], [0], [1], [0, 0, 1, 1], [], []>} : vector<30x128xf32>, vector<128x16xf32>, vector<30x16xf32> -> vector<30x16xf32>
    %c0_27 = arith.constant 0 : index
    %c0_28 = arith.constant 0 : index
    %31 = vector.load %arg11[%c0_27, %c0_28] : memref<30x1xf32, #tpu.memory_space<vmem>>, vector<30x1xf32>
    %32 = vector.broadcast %31 : vector<30x1xf32> to vector<30x16xf32>
    %33 = arith.addf %30, %32 : vector<30x16xf32>
    %c0_29 = arith.constant 0 : index
    %c0_30 = arith.constant 0 : index
    %34 = vector.load %arg12[%c0_29, %c0_30] : memref<30x16xf32, #tpu.memory_space<vmem>>, vector<30x16xf32>
    tpu.vector_store %arg12[%c0_29, %c0_30], %33 {strides = array<i32>} : memref<30x16xf32, #tpu.memory_space<vmem>>, vector<30x16xf32>,
    return
  }
  func.func @transform_0(%arg0: i32) -> (i32, i32) {
    %c0_i32 = arith.constant 0 : i32
    %c0_i32_0 = arith.constant 0 : i32
    return %c0_i32, %arg0 : i32, i32
  }
  func.func @transform_1(%arg0: i32) -> (i32, i32) {
    %c0_i32 = arith.constant 0 : i32
    %c0_i32_0 = arith.constant 0 : i32
    %c0_i32_1 = arith.constant 0 : i32
    return %c0_i32, %c0_i32_0 : i32, i32
  }
  func.func @transform_2(%arg0: i32) -> (i32, i32) {
    %c0_i32 = arith.constant 0 : i32
    %c0_i32_0 = arith.constant 0 : i32
    %c0_i32_1 = arith.constant 0 : i32
    return %c0_i32, %c0_i32_0 : i32, i32
  }
  func.func @transform_3(%arg0: i32) -> (i32, i32) {
    %c0_i32 = arith.constant 0 : i32
    %c0_i32_0 = arith.constant 0 : i32
    %c0_i32_1 = arith.constant 0 : i32
    return %c0_i32, %c0_i32_0 : i32, i32
  }
  func.func @transform_4(%arg0: i32) -> (i32, i32) {
    %c0_i32 = arith.constant 0 : i32
    %c0_i32_0 = arith.constant 0 : i32
    %c0_i32_1 = arith.constant 0 : i32
    return %c0_i32, %c0_i32_0 : i32, i32
  }
  func.func @transform_5(%arg0: i32) -> (i32, i32) {
    %c0_i32 = arith.constant 0 : i32
    %c0_i32_0 = arith.constant 0 : i32
    %c0_i32_1 = arith.constant 0 : i32
    return %c0_i32, %c0_i32_0 : i32, i32
  }
  func.func @transform_6(%arg0: i32) -> (i32, i32) {
    %c0_i32 = arith.constant 0 : i32
    %c0_i32_0 = arith.constant 0 : i32
    %c0_i32_1 = arith.constant 0 : i32
    return %c0_i32, %c0_i32_0 : i32, i32
  }
  func.func @transform_7(%arg0: i32) -> (i32, i32) {
    %c0_i32 = arith.constant 0 : i32
    %c0_i32_0 = arith.constant 0 : i32
    %c0_i32_1 = arith.constant 0 : i32
    return %c0_i32, %c0_i32_0 : i32, i32
  }
  func.func @transform_8(%arg0: i32) -> (i32, i32) {
    %c0_i32 = arith.constant 0 : i32
    %c0_i32_0 = arith.constant 0 : i32
    %c0_i32_1 = arith.constant 0 : i32
    return %c0_i32, %c0_i32_0 : i32, i32
  }
  func.func @transform_9(%arg0: i32) -> (i32, i32) {
    %c0_i32 = arith.constant 0 : i32
    %c0_i32_0 = arith.constant 0 : i32
    %c0_i32_1 = arith.constant 0 : i32
    return %c0_i32, %c0_i32_0 : i32, i32
  }
  func.func @transform_10(%arg0: i32) -> (i32, i32) {
    %c0_i32 = arith.constant 0 : i32
    %c0_i32_0 = arith.constant 0 : i32
    %c0_i32_1 = arith.constant 0 : i32
    return %c0_i32, %c0_i32_0 : i32, i32
  }
  func.func @transform_11(%arg0: i32) -> (i32, i32) {
    %c0_i32 = arith.constant 0 : i32
    %c0_i32_0 = arith.constant 0 : i32
    return %c0_i32, %arg0 : i32, i32
  }
}

</mosaic_0001>

<bundles_post_ra>
// kernel: autoencoder_forward.1
= control target key start
LH: loop header
LB: loop body
LE: loop exit
PB: predicated region body
PF: predicated region fallthrough
CT: control target
= control target key end

     0   :  { %v1612_v0 = vmov 0   ;;  %vm203_vm0 = vcmask 1045504   ;;  %vm154_vm1 = vcmask 244736   ;;  %vm1613_vm2 = vmmov 1   ;;  %s2050_s2 = inlined_call_operand.vmem [shape: f32[128,1], index: 2, kind: input, shape index: {}]   ;;  %s2051_s0 = inlined_call_operand.vmem [shape: f32[30,16], index: 0, kind: input, shape index: {}]   ;;  %s2052_s1 = inlined_call_operand.vmem [shape: f32[128,30], index: 1, kind: input, shape index: {}]   ;;  %s2053_s4 = inlined_call_operand.vmem [shape: f32[64,1], index: 4, kind: input, shape index: {}]   ;;  %s2054_s6 = inlined_call_operand.vmem [shape: f32[64,1], index: 6, kind: input, shape index: {}]   ;;  %s2055_s8 = inlined_call_operand.vmem [shape: f32[128,1], index: 8, kind: input, shape index: {}]   ;;  %s2056_s10 = inlined_call_operand.vmem [shape: f32[30,1], index: 10, kind: input, shape index: {}]   ;;  %s2057_s3 = inlined_call_operand.vmem [shape: f32[64,128], index: 3, kind: input, shape index: {}]   ;;  %s2058_s5 = inlined_call_operand.vmem [shape: f32[64,64], index: 5, kind: input, shape index: {}]   ;;  %s2059_s7 = inlined_call_operand.vmem [shape: f32[128,64], index: 7, kind: input, shape index: {}]   ;;  %s2060_s9 = inlined_call_operand.vmem [shape: f32[30,128], index: 9, kind: input, shape index: {}]   ;;  %s2061_s11 = inlined_call_operand.vmem [shape: f32[30,16], index: 11, kind: output, shape index: {}]  }
   0x1   :  { %1611 = vset.pattern.permute.xlu1 %v1612_v0  ;;  %1610 = vset.pattern.permute.xlu0 %v1612_v0  ;;  %v60_v1 = vld [vmem:[%s2050_s2 + $0x10] sm:$0xff]  ;;  %v58_v2 = vld [vmem:[%s2050_s2] sm:$0xff]  ;;  %v39_v4 = vld [vmem:[%s2051_s0 + $0x8] sm:$0xff]  ;;  %vm593_vm4 = vcmask 523264   ;;  %vm1165_vm5 = vcmask 130048   ;;  %vm1169_vm6 = vcmask 128000  }
   0x2   :  { %v38_v3 = vld [vmem:[%s2051_s0] sm:$0xff]  ;;  %86 = vperm.xlu1 %1611, %v60_v1   ;;  %76 = vperm.xlu0 %1610, %v58_v2   ;;  %v61_v6 = vld [vmem:[%s2050_s2 + $0x18] sm:$0xff]  ;;  %v40_v7 = vld [vmem:[%s2051_s0 + $0x10] sm:$0xff] }
   0x3   :  { %v1502_v5 = vpack.c.bf16 %v39_v4, %v38_v3  ;;  %v41_v8 = vld [vmem:[%s2051_s0 + $0x18] sm:$0x3f]  ;;  %v59_v9 = vld [vmem:[%s2050_s2 + $0x8] sm:$0xff]  ;;  %vm1507_vm3 = vmpackc.low %vm203_vm0, %vm1613_vm2 }
   0x4   :  { %v1506_v10 = vpack.c.bf16 %v41_v8, %v40_v7  ;;  %v42_v11 = vld [vmem:[%s2052_s1] sm:$0xff]  ;;  %v63_v12 = vld [vmem:[%s2050_s2 + $0x28] sm:$0xff]  ;;  %v65_v15 = vld [vmem:[%s2050_s2 + $0x38] sm:$0xff] }
   0x5   :  { %1503 = vmatprep.subr.bf16.mxu0 %v1502_v5  ;;  %1328 = vmatprep.mubr.msk.f32.mxu0 %vm154_vm1, %v42_v11  ;;  %v62_v13 = vld [vmem:[%s2050_s2 + $0x20] sm:$0xff]  ;;  %v43_v14 = vld [vmem:[%s2052_s1 + $0x8] sm:$0xff]  ;;  %v44_v16 = vld [vmem:[%s2052_s1 + $0x10] sm:$0xff] }
   0x6   :  { %1505 = vmatpush3.bf16.msra.mxu0 %v1502_v5  ;;  %91 = vperm.xlu1 %1611, %v61_v6   ;;  %v64_v17 = vld [vmem:[%s2050_s2 + $0x30] sm:$0xff]  ;;  %v45_v18 = vld [vmem:[%s2052_s1 + $0x18] sm:$0xff]  ;;  %v67_v19 = vld [vmem:[%s2050_s2 + $0x48] sm:$0xff] }
   0x7   :  { %81 = vperm.xlu0 %1610, %v59_v9   ;;  %1508 = vmatprep.subr.msk.bf16.mxu0 %vm1507_vm3, %v1506_v10  ;;  %v46_v20 = vld [vmem:[%s2052_s1 + $0x20] sm:$0xff]  ;;  %v47_v22 = vld [vmem:[%s2052_s1 + $0x28] sm:$0xff]  ;;  %v69_v23 = vld [vmem:[%s2050_s2 + $0x58] sm:$0xff] }
   0x8   :  { %v66_v21 = vld [vmem:[%s2050_s2 + $0x40] sm:$0xff]  ;;  %v48_v24 = vld [vmem:[%s2052_s1 + $0x30] sm:$0xff]  ;;  %v49_v26 = vld [vmem:[%s2052_s1 + $0x38] sm:$0xff] }
   0x9   :  { %v68_v25 = vld [vmem:[%s2050_s2 + $0x50] sm:$0xff]  ;;  %v71_v27 = vld [vmem:[%s2050_s2 + $0x68] sm:$0xff]  ;;  %v50_v28 = vld [vmem:[%s2052_s1 + $0x40] sm:$0xff] }
   0xa   :  { %1511 = vmatpush3.bf16.msk.msra.mxu0 %vm1507_vm3, %v1506_v10  ;;  %101 = vperm.xlu1 %1611, %v63_v12   ;;  %v70_v29 = vld [vmem:[%s2050_s2 + $0x60] sm:$0xff]  ;;  %v51_v30 = vld [vmem:[%s2052_s1 + $0x48] sm:$0xff]  ;;  %v73_v31 = vld [vmem:[%s2050_s2 + $0x78] sm:$0xff] }
   0xb   :  { %96 = vperm.xlu0 %1610, %v62_v13   ;;  %v52_v32 = vld [vmem:[%s2052_s1 + $0x50] sm:$0xff]  ;;  %v53_v34 = vld [vmem:[%s2052_s1 + $0x58] sm:$0xff]  ;;  %v377_v35 = vld [vmem:[%s2053_s4 + $0x8] sm:$0xff] }
   0xc   :  { %v72_v33 = vld [vmem:[%s2050_s2 + $0x70] sm:$0xff]  ;;  %v54_v36 = vld [vmem:[%s2052_s1 + $0x60] sm:$0xff]  ;;  %v55_v38 = vld [vmem:[%s2052_s1 + $0x68] sm:$0xff] }
   0xd   :  { %1329 = vmatmul.mubr.msk.f32.vlgmr.msra.gmra.mrb[0].mxu0 %vm154_vm1, %v43_v14  ;;  %v376_v37 = vld [vmem:[%s2053_s4] sm:$0xff]  ;;  %v379_v39 = vld [vmem:[%s2053_s4 + $0x18] sm:$0xff]  ;;  %v56_v40 = vld [vmem:[%s2052_s1 + $0x70] sm:$0xff] }
   0xe   :  { %111 = vperm.xlu1 %1611, %v65_v15   ;;  %1331 = vmatprep.mubr.msk.f32.mxu0 %vm154_vm1, %v44_v16  ;;  %v378_v41 = vld [vmem:[%s2053_s4 + $0x10] sm:$0xff]  ;;  %v57_v42 = vld [vmem:[%s2052_s1 + $0x78] sm:$0xff]  ;;  %v381_v43 = vld [vmem:[%s2053_s4 + $0x28] sm:$0xff] }
   0xf   :  { %106 = vperm.xlu0 %1610, %v64_v17   ;;  %v380_v44 = vld [vmem:[%s2053_s4 + $0x20] sm:$0xff]  ;;  %v383_v45 = vld [vmem:[%s2053_s4 + $0x38] sm:$0xff]  ;;  %v382_v46 = vld [vmem:[%s2053_s4 + $0x30] sm:$0xff] }
  0x10   :  { %v546_v47 = vld [vmem:[%s2054_s6 + $0x8] sm:$0xff]  ;;  %v545_v48 = vld [vmem:[%s2054_s6] sm:$0xff]  ;;  %v548_v49 = vld [vmem:[%s2054_s6 + $0x18] sm:$0xff] }
  0x11   :  { %1332 = vmatmul.mubr.msk.f32.gmra.mrb[2].mxu0 %vm154_vm1, %v45_v18  ;;  %v547_v50 = vld [vmem:[%s2054_s6 + $0x10] sm:$0xff]  ;;  %v550_v51 = vld [vmem:[%s2054_s6 + $0x28] sm:$0xff]  ;;  %v549_v52 = vld [vmem:[%s2054_s6 + $0x20] sm:$0xff] }
  0x12   :  { %121 = vperm.xlu1 %1611, %v67_v19   ;;  %1334 = vmatprep.mubr.msk.f32.mxu0 %vm154_vm1, %v46_v20  ;;  %v552_v53 = vld [vmem:[%s2054_s6 + $0x38] sm:$0xff]  ;;  %v551_v54 = vld [vmem:[%s2054_s6 + $0x30] sm:$0xff]  ;;  %v748_v55 = vld [vmem:[%s2055_s8 + $0x8] sm:$0xff] }
  0x13   :  { %116 = vperm.xlu0 %1610, %v66_v21   ;;  %v747_v56 = vld [vmem:[%s2055_s8] sm:$0xff]  ;;  %v750_v57 = vld [vmem:[%s2055_s8 + $0x18] sm:$0xff]  ;;  %v749_v58 = vld [vmem:[%s2055_s8 + $0x10] sm:$0xff] }
  0x14   :  { %v752_v59 = vld [vmem:[%s2055_s8 + $0x28] sm:$0xff]  ;;  %v751_v60 = vld [vmem:[%s2055_s8 + $0x20] sm:$0xff]  ;;  %v754_v61 = vld [vmem:[%s2055_s8 + $0x38] sm:$0xff] }
  0x15   :  { %1335 = vmatmul.mubr.msk.f32.gmra.mrb[4].mxu0 %vm154_vm1, %v47_v22  ;;  %v753_v62 = vld [vmem:[%s2055_s8 + $0x30] sm:$0xff]  ;;  %v756_v63 = vld [vmem:[%s2055_s8 + $0x48] sm:$0xff]  ;;  %v755_v0 = vld [vmem:[%s2055_s8 + $0x40] sm:$0xff] }
  0x16   :  { %131 = vperm.xlu1 %1611, %v69_v23   ;;  %1337 = vmatprep.mubr.msk.f32.mxu0 %vm154_vm1, %v48_v24  ;;  %v758_v1 = vld [vmem:[%s2055_s8 + $0x58] sm:$0xff]  ;;  %v757_v2 = vld [vmem:[%s2055_s8 + $0x50] sm:$0xff]  ;;  %v760_v3 = vld [vmem:[%s2055_s8 + $0x68] sm:$0xff] }
  0x17   :  { %126 = vperm.xlu0 %1610, %v68_v25   ;;  %v759_v4 = vld [vmem:[%s2055_s8 + $0x60] sm:$0xff]  ;;  %v762_v5 = vld [vmem:[%s2055_s8 + $0x78] sm:$0xff]  ;;  %v761_v6 = vld [vmem:[%s2055_s8 + $0x70] sm:$0xff] }
  0x18   :  { %v1057_v7 = vld [vmem:[%s2056_s10 + $0x8] sm:$0xff]  ;;  %v1056_v8 = vld [vmem:[%s2056_s10] sm:$0xff]  ;;  %v1059_v9 = vld [vmem:[%s2056_s10 + $0x18] sm:$0x3f] }
  0x19   :  { %1338 = vmatmul.mubr.msk.f32.gmra.mrb[6].mxu0 %vm154_vm1, %v49_v26  ;;  %v1058_v10 = vld [vmem:[%s2056_s10 + $0x10] sm:$0xff]  ;;  %v368_v11 = vld [vmem:[%s2057_s3] sm:$0xff] }
  0x1a   :  { %141 = vperm.xlu1 %1611, %v71_v27   ;;  %1340 = vmatprep.mubr.msk.f32.mxu0 %vm154_vm1, %v50_v28 }
  0x1b   :  { %136 = vperm.xlu0 %1610, %v70_v29   ;;  %1384 = vmatprep.mubr.f32.mxu1 %v368_v11 }
  0x1d   :  { %1341 = vmatmul.mubr.msk.f32.gmra.mrb[8].mxu0 %vm154_vm1, %v51_v30 }
  0x1e   :  { %151 = vperm.xlu1 %1611, %v73_v31   ;;  %1343 = vmatprep.mubr.msk.f32.mxu0 %vm154_vm1, %v52_v32 }
  0x1f   :  { %146 = vperm.xlu0 %1610, %v72_v33  }
  0x21   :  { %1344 = vmatmul.mubr.msk.f32.gmra.mrb[10].mxu0 %vm154_vm1, %v53_v34 }
  0x22   :  { %391 = vperm.xlu1 %1611, %v377_v35   ;;  %1346 = vmatprep.mubr.msk.f32.mxu0 %vm154_vm1, %v54_v36 }
  0x23   :  { %386 = vperm.xlu0 %1610, %v376_v37  }
  0x25   :  { %1347 = vmatmul.mubr.msk.f32.gmra.mrb[12].mxu0 %vm154_vm1, %v55_v38 }
  0x26   :  { %401 = vperm.xlu1 %1611, %v379_v39   ;;  %1349 = vmatprep.mubr.msk.f32.mxu0 %vm154_vm1, %v56_v40 }
  0x27   :  { %396 = vperm.xlu0 %1610, %v378_v41  }
  0x29   :  { %1350 = vmatmul.mubr.msk.f32.gmra.mrb[14].mxu0 %vm154_vm1, %v57_v42 }
  0x2a   :  { %411 = vperm.xlu1 %1611, %v381_v43  }
  0x2b   :  { %406 = vperm.xlu0 %1610, %v380_v44  }
  0x2e   :  { %421 = vperm.xlu1 %1611, %v383_v45  }
  0x2f   :  { %416 = vperm.xlu0 %1610, %v382_v46  }
  0x32   :  { %560 = vperm.xlu1 %1611, %v546_v47  }
  0x33   :  { %555 = vperm.xlu0 %1610, %v545_v48  }
  0x36   :  { %570 = vperm.xlu1 %1611, %v548_v49  }
  0x37   :  { %565 = vperm.xlu0 %1610, %v547_v50  }
  0x3a   :  { %580 = vperm.xlu1 %1611, %v550_v51  }
  0x3b   :  { %575 = vperm.xlu0 %1610, %v549_v52  }
  0x3e   :  { %590 = vperm.xlu1 %1611, %v552_v53  }
  0x3f   :  { %585 = vperm.xlu0 %1610, %v551_v54  }
  0x42   :  { %770 = vperm.xlu1 %1611, %v748_v55  }
  0x43   :  { %765 = vperm.xlu0 %1610, %v747_v56  }
  0x46   :  { %780 = vperm.xlu1 %1611, %v750_v57  }
  0x47   :  { %775 = vperm.xlu0 %1610, %v749_v58  }
  0x4a   :  { %790 = vperm.xlu1 %1611, %v752_v59  }
  0x4b   :  { %785 = vperm.xlu0 %1610, %v751_v60  }
  0x4e   :  { %800 = vperm.xlu1 %1611, %v754_v61  }
  0x4f   :  { %795 = vperm.xlu0 %1610, %v753_v62  }
  0x52   :  { %810 = vperm.xlu1 %1611, %v756_v63  }
  0x53   :  { %805 = vperm.xlu0 %1610, %v755_v0  }
  0x56   :  { %820 = vperm.xlu1 %1611, %v758_v1  }
  0x57   :  { %815 = vperm.xlu0 %1610, %v757_v2  }
  0x5a   :  { %830 = vperm.xlu1 %1611, %v760_v3  }
  0x5b   :  { %825 = vperm.xlu0 %1610, %v759_v4  }
  0x5e   :  { %840 = vperm.xlu1 %1611, %v762_v5  }
  0x5f   :  { %835 = vperm.xlu0 %1610, %v761_v6  }
  0x62   :  { %1067 = vperm.xlu1 %1611, %v1057_v7  }
  0x63   :  { %1062 = vperm.xlu0 %1610, %v1056_v8  }
  0x66   :  { %1077 = vperm.xlu1 %1611, %v1059_v9  }
  0x67   :  { %1072 = vperm.xlu0 %1610, %v1058_v10  }
  0x81   :  { %v87_v12 = vpop.permute.xlu1 %86  ;;  %v77_v13 = vpop.permute.xlu0 %76 }
  0x85   :  { %v92_v14 = vpop.permute.xlu1 %91 }
  0x86   :  { %v82_v15 = vpop.permute.xlu0 %81 }
  0x89   :  { %v102_v16 = vpop.permute.xlu1 %101 }
  0x8a   :  { %v97_v17 = vpop.permute.xlu0 %96 }
  0x8d   :  { %v112_v23 = vpop.permute.xlu1 %111 }
  0x8e   :  { %v107_v26 = vpop.permute.xlu0 %106 }
  0x91   :  { %v122_v36 = vpop.permute.xlu1 %121 }
  0x92   :  { %v117_v39 = vpop.permute.xlu0 %116 }
  0x95   :  { %v132_v48 = vpop.permute.xlu1 %131 }
  0x96   :  { %v127_v51 = vpop.permute.xlu0 %126 }
  0x99   :  { %v142_v61 = vpop.permute.xlu1 %141 }
  0x9a   :  { %v137_v0 = vpop.permute.xlu0 %136 }
  0x9d   :  { %v152_v9 = vpop.permute.xlu1 %151 }
  0xe0   :  { %v1330_v18 = vpop.f32.mrb[0].mxu0 }
  0xe1   :  { %v279_v19 = vadd.f32 %v1330_v18, %v82_v15  ;;  %v273_v20 = vpop.f32.mrb[1].mxu0 }
  0xe2   :  { %v274_v21 = vadd.f32 %v273_v20, %v77_v13  ;;  %v369_v20 = vld [vmem:[%s2057_s3 + $0x8] sm:$0xff] }
  0xe3   :  { %v353_v22 = vmax.f32 %v279_v19, 0.0 }
  0xe4   :  { %v352_v24 = vmax.f32 %v274_v21, 0.0  ;;  %v1333_v25 = vpop.f32.mrb[2].mxu0  ;;  %v370_v21 = vld [vmem:[%s2057_s3 + $0x10] sm:$0xff] }
  0xe5   :  { %v289_v27 = vadd.f32 %v1333_v25, %v92_v14  ;;  %v283_v28 = vpop.f32.mrb[3].mxu0  ;;  %v374_v25 = vld [vmem:[%s2057_s3 + $0x30] sm:$0xff] }
  0xe6   :  { %v284_v29 = vadd.f32 %v283_v28, %v87_v12  ;;  %v1512_v30 = vpack.c.bf16 %v353_v22, %v352_v24  ;;  %v147_v12 = vpop.permute.xlu0 %146  ;;  %v371_v22 = vld [vmem:[%s2057_s3 + $0x18] sm:$0xff]  ;;  %v373_v24 = vld [vmem:[%s2057_s3 + $0x28] sm:$0xff]  ;;  %v392_v28 = vpop.permute.xlu1 %391 }
  0xe7   :  { %v355_v31 = vmax.f32 %v289_v27, 0.0  ;;  %v537_v27 = vld [vmem:[%s2058_s5] sm:$0xff] }
  0xe8   :  { %v354_v32 = vmax.f32 %v284_v29, 0.0  ;;  %v1336_v33 = vpop.f32.mrb[4].mxu0  ;;  %1513 = vmatprep.subr.bf16.mxu1 %v1512_v30  ;;  %1412 = vmatprep.mubr.msk.f32.mxu0 %vm593_vm4, %v537_v27 }
  0xe9   :  { %v299_v34 = vadd.f32 %v1336_v33, %v102_v16  ;;  %v293_v35 = vpop.f32.mrb[5].mxu0  ;;  %1515 = vmatpush3.bf16.msra.mxu1 %v1512_v30 }
  0xea   :  { %v1516_v37 = vpack.c.bf16 %v355_v31, %v354_v32  ;;  %v294_v38 = vadd.f32 %v293_v35, %v97_v17  ;;  %v387_v29 = vpop.permute.xlu0 %386  ;;  %v402_v30 = vpop.permute.xlu1 %401 }
  0xeb   :  { %v357_v40 = vmax.f32 %v299_v34, 0.0 }
  0xec   :  { %v356_v41 = vmax.f32 %v294_v38, 0.0  ;;  %v1339_v42 = vpop.f32.mrb[6].mxu0  ;;  %1517 = vmatprep.subr.bf16.mxu1 %v1516_v37 }
  0xed   :  { %v309_v43 = vadd.f32 %v1339_v42, %v112_v23  ;;  %v303_v44 = vpop.f32.mrb[7].mxu0  ;;  %1519 = vmatpush3.bf16.msra.mxu1 %v1516_v37  ;;  %v372_v23 = vld [vmem:[%s2057_s3 + $0x20] sm:$0xff] }
  0xee   :  { %v1520_v45 = vpack.c.bf16 %v357_v40, %v356_v41  ;;  %v304_v46 = vadd.f32 %v303_v44, %v107_v26  ;;  %v375_v26 = vld [vmem:[%s2057_s3 + $0x38] sm:$0xff]  ;;  %v397_v32 = vpop.permute.xlu0 %396  ;;  %v412_v41 = vpop.permute.xlu1 %411 }
  0xef   :  { %v359_v47 = vmax.f32 %v309_v43, 0.0 }
  0xf0   :  { %v358_v49 = vmax.f32 %v304_v46, 0.0  ;;  %v1342_v50 = vpop.f32.mrb[8].mxu0  ;;  %1521 = vmatprep.subr.bf16.mxu1 %v1520_v45 }
  0xf1   :  { %v319_v52 = vadd.f32 %v1342_v50, %v122_v36  ;;  %v313_v53 = vpop.f32.mrb[9].mxu0  ;;  %1523 = vmatpush3.bf16.msra.mxu1 %v1520_v45 }
  0xf2   :  { %v1524_v54 = vpack.c.bf16 %v359_v47, %v358_v49  ;;  %v314_v55 = vadd.f32 %v313_v53, %v117_v39  ;;  %v407_v44 = vpop.permute.xlu0 %406  ;;  %v422_v53 = vpop.permute.xlu1 %421 }
  0xf3   :  { %v361_v56 = vmax.f32 %v319_v52, 0.0 }
  0xf4   :  { %v360_v57 = vmax.f32 %v314_v55, 0.0  ;;  %v1345_v58 = vpop.f32.mrb[10].mxu0  ;;  %1525 = vmatprep.subr.bf16.mxu1 %v1524_v54 }
  0xf5   :  { %v329_v59 = vadd.f32 %v1345_v58, %v132_v48  ;;  %v323_v60 = vpop.f32.mrb[11].mxu0  ;;  %1527 = vmatpush3.bf16.msra.mxu1 %v1524_v54 }
  0xf6   :  { %v1528_v62 = vpack.c.bf16 %v361_v56, %v360_v57  ;;  %v324_v63 = vadd.f32 %v323_v60, %v127_v51  ;;  %v417_v56 = vpop.permute.xlu0 %416 }
  0xf7   :  { %v363_v1 = vmax.f32 %v329_v59, 0.0 }
  0xf8   :  { %v362_v2 = vmax.f32 %v324_v63, 0.0  ;;  %v1348_v3 = vpop.f32.mrb[12].mxu0  ;;  %1529 = vmatprep.subr.bf16.mxu1 %v1528_v62 }
  0xf9   :  { %v339_v4 = vadd.f32 %v1348_v3, %v142_v61  ;;  %v333_v5 = vpop.f32.mrb[13].mxu0  ;;  %1531 = vmatpush3.bf16.msra.mxu1 %v1528_v62  ;;  %v541_v3 = vld [vmem:[%s2058_s5 + $0x20] sm:$0xff] }
  0xfa   :  { %v1532_v6 = vpack.c.bf16 %v363_v1, %v362_v2  ;;  %v334_v7 = vadd.f32 %v333_v5, %v137_v0  ;;  %v538_v0 = vld [vmem:[%s2058_s5 + $0x8] sm:$0xff]  ;;  %v539_v1 = vld [vmem:[%s2058_s5 + $0x10] sm:$0xff]  ;;  %v540_v2 = vld [vmem:[%s2058_s5 + $0x18] sm:$0xff] }
  0xfb   :  { %v365_v8 = vmax.f32 %v339_v4, 0.0  ;;  %v542_v4 = vld [vmem:[%s2058_s5 + $0x28] sm:$0xff]  ;;  %v543_v5 = vld [vmem:[%s2058_s5 + $0x30] sm:$0xff] }
  0xfc   :  { %v364_v10 = vmax.f32 %v334_v7, 0.0  ;;  %v1351_v11 = vpop.f32.mrb[14].mxu0  ;;  %1533 = vmatprep.subr.bf16.mxu1 %v1532_v6  ;;  %v731_v7 = vld [vmem:[%s2059_s7] sm:$0xff] }
  0xfd   :  { %v349_v13 = vadd.f32 %v1351_v11, %v152_v9  ;;  %v343_v14 = vpop.f32.mrb[15].mxu0  ;;  %1535 = vmatpush3.bf16.msra.mxu1 %v1532_v6  ;;  %v544_v6 = vld [vmem:[%s2058_s5 + $0x38] sm:$0xff]  ;;  %v556_v9 = vpop.permute.xlu0 %555 }
  0xfe   :  { %v1536_v15 = vpack.c.bf16 %v365_v8, %v364_v10  ;;  %v344_v16 = vadd.f32 %v343_v14, %v147_v12  ;;  %v561_v8 = vpop.permute.xlu1 %560 }
  0xff   :  { %v367_v17 = vmax.f32 %v349_v13, 0.0 }
 0x100   :  { %v366_v18 = vmax.f32 %v344_v16, 0.0  ;;  %1537 = vmatprep.subr.bf16.mxu1 %v1536_v15 }
 0x101   :  { %1539 = vmatpush3.bf16.msra.mxu1 %v1536_v15  ;;  %v566_v12 = vpop.permute.xlu0 %565 }
 0x102   :  { %v1540_v19 = vpack.c.bf16 %v367_v17, %v366_v18  ;;  %v571_v10 = vpop.permute.xlu1 %570 }
 0x104   :  { %1541 = vmatprep.subr.bf16.mxu1 %v1540_v19 }
 0x105   :  { %1543 = vmatpush3.bf16.msra.mxu1 %v1540_v19 }
 0x108   :  { %1385 = vmatmul.mubr.f32.vlgmr.msra.gmra.mrb[0].mxu1 %v369_v20 }
 0x109   :  { %1387 = vmatprep.mubr.f32.mxu1 %v370_v21  ;;  %v581_v21 = vpop.permute.xlu1 %580 }
 0x10c   :  { %1388 = vmatmul.mubr.f32.gmra.mrb[2].mxu1 %v371_v22 }
 0x10d   :  { %1390 = vmatprep.mubr.f32.mxu1 %v372_v23 }
 0x110   :  { %1391 = vmatmul.mubr.f32.gmra.mrb[4].mxu1 %v373_v24  ;;  %v576_v24 = vpop.permute.xlu0 %575 }
 0x111   :  { %1393 = vmatprep.mubr.f32.mxu1 %v374_v25 }
 0x114   :  { %1394 = vmatmul.mubr.f32.gmra.mrb[6].mxu1 %v375_v26 }
 0x115   :  { %1440 = vmatprep.mubr.msk.f32.mxu1 %vm593_vm4, %v731_v7 }
 0x1db   :  { %v1386_v31 = vpop.f32.mrb[0].mxu1 }
 0x1dc   :  { %v496_v33 = vadd.f32 %v1386_v31, %v392_v28  ;;  %v490_v34 = vpop.f32.mrb[1].mxu1 }
 0x1dd   :  { %v491_v35 = vadd.f32 %v490_v34, %v387_v29 }
 0x1de   :  { %v530_v36 = vmax.f32 %v496_v33, 0.0  ;;  %v591_v33 = vpop.permute.xlu1 %590 }
 0x1df   :  { %v529_v37 = vmax.f32 %v491_v35, 0.0  ;;  %v1389_v38 = vpop.f32.mrb[2].mxu1 }
 0x1e0   :  { %v506_v39 = vadd.f32 %v1389_v38, %v402_v30  ;;  %v500_v40 = vpop.f32.mrb[3].mxu1 }
 0x1e1   :  { %v1544_v42 = vpack.c.bf16 %v530_v36, %v529_v37  ;;  %v501_v43 = vadd.f32 %v500_v40, %v397_v32  ;;  %v586_v36 = vpop.permute.xlu0 %585 }
 0x1e2   :  { %v532_v45 = vmax.f32 %v506_v39, 0.0 }
 0x1e3   :  { %v531_v46 = vmax.f32 %v501_v43, 0.0  ;;  %v1392_v47 = vpop.f32.mrb[4].mxu1  ;;  %1545 = vmatprep.subr.bf16.mxu0 %v1544_v42 }
 0x1e4   :  { %v516_v48 = vadd.f32 %v1392_v47, %v412_v41  ;;  %v510_v49 = vpop.f32.mrb[5].mxu1  ;;  %1547 = vmatpush3.bf16.msra.mxu0 %v1544_v42  ;;  %v735_v47 = vld [vmem:[%s2059_s7 + $0x20] sm:$0xff] }
 0x1e5   :  { %v1548_v50 = vpack.c.bf16 %v532_v45, %v531_v46  ;;  %v511_v51 = vadd.f32 %v510_v49, %v407_v44  ;;  %v732_v44 = vld [vmem:[%s2059_s7 + $0x8] sm:$0xff]  ;;  %v733_v45 = vld [vmem:[%s2059_s7 + $0x10] sm:$0xff]  ;;  %v734_v46 = vld [vmem:[%s2059_s7 + $0x18] sm:$0xff] }
 0x1e6   :  { %v534_v52 = vmax.f32 %v516_v48, 0.0  ;;  %v736_v48 = vld [vmem:[%s2059_s7 + $0x28] sm:$0xff]  ;;  %v737_v49 = vld [vmem:[%s2059_s7 + $0x30] sm:$0xff] }
 0x1e7   :  { %v533_v54 = vmax.f32 %v511_v51, 0.0  ;;  %v1395_v55 = vpop.f32.mrb[6].mxu1  ;;  %1549 = vmatprep.subr.bf16.mxu0 %v1548_v50  ;;  %v739_v51 = vld [vmem:[%s2059_s7 + $0x40] sm:$0xff] }
 0x1e8   :  { %v526_v57 = vadd.f32 %v1395_v55, %v422_v53  ;;  %v520_v58 = vpop.f32.mrb[7].mxu1  ;;  %1551 = vmatpush3.bf16.msra.mxu0 %v1548_v50  ;;  %v738_v50 = vld [vmem:[%s2059_s7 + $0x38] sm:$0xff]  ;;  %v741_v53 = vld [vmem:[%s2059_s7 + $0x50] sm:$0xff]  ;;  %v743_v55 = vld [vmem:[%s2059_s7 + $0x60] sm:$0xff] }
 0x1e9   :  { %v1552_v59 = vpack.c.bf16 %v534_v52, %v533_v54  ;;  %v521_v60 = vadd.f32 %v520_v58, %v417_v56  ;;  %v740_v52 = vld [vmem:[%s2059_s7 + $0x48] sm:$0xff]  ;;  %v742_v54 = vld [vmem:[%s2059_s7 + $0x58] sm:$0xff] }
 0x1ea   :  { %v536_v61 = vmax.f32 %v526_v57, 0.0  ;;  %v744_v56 = vld [vmem:[%s2059_s7 + $0x68] sm:$0xff]  ;;  %v745_v57 = vld [vmem:[%s2059_s7 + $0x70] sm:$0xff]  ;;  %v746_v58 = vld [vmem:[%s2059_s7 + $0x78] sm:$0xff] }
 0x1eb   :  { %v535_v62 = vmax.f32 %v521_v60, 0.0  ;;  %1553 = vmatprep.subr.bf16.mxu0 %v1552_v59  ;;  %v771_v60 = vpop.permute.xlu1 %770 }
 0x1ec   :  { %1555 = vmatpush3.bf16.msra.mxu0 %v1552_v59  ;;  %v1052_v59 = vld [vmem:[%s2060_s9] sm:$0xff] }
 0x1ed   :  { %v1556_v63 = vpack.c.bf16 %v536_v61, %v535_v62  ;;  %v766_v61 = vpop.permute.xlu0 %765 }
 0x1ef   :  { %1557 = vmatprep.subr.bf16.mxu0 %v1556_v63  ;;  %v781_v62 = vpop.permute.xlu1 %780 }
 0x1f0   :  { %1559 = vmatpush3.bf16.msra.mxu0 %v1556_v63 }
 0x1f1   :  { %v776_v63 = vpop.permute.xlu0 %775 }
 0x1f3   :  { %1413 = vmatmul.mubr.msk.f32.vlgmr.msra.gmra.mrb[16].mxu0 %vm593_vm4, %v538_v0  ;;  %v791_v0 = vpop.permute.xlu1 %790 }
 0x1f4   :  { %1415 = vmatprep.mubr.msk.f32.mxu0 %vm593_vm4, %v539_v1 }
 0x1f5   :  { %v786_v1 = vpop.permute.xlu0 %785 }
 0x1f7   :  { %1416 = vmatmul.mubr.msk.f32.gmra.mrb[18].mxu0 %vm593_vm4, %v540_v2  ;;  %v801_v7 = vpop.permute.xlu1 %800 }
 0x1f8   :  { %1418 = vmatprep.mubr.msk.f32.mxu0 %vm593_vm4, %v541_v3 }
 0x1fb   :  { %1419 = vmatmul.mubr.msk.f32.gmra.mrb[20].mxu0 %vm593_vm4, %v542_v4 }
 0x1fc   :  { %1421 = vmatprep.mubr.msk.f32.mxu0 %vm593_vm4, %v543_v5 }
 0x1ff   :  { %1422 = vmatmul.mubr.msk.f32.gmra.mrb[22].mxu0 %vm593_vm4, %v544_v6 }
 0x200   :  { %1496 = vmatprep.mubr.f32.mxu0 %v1052_v59 }
 0x2c6   :  { %v1414_v11 = vpop.f32.mrb[16].mxu0 }
 0x2c7   :  { %v690_v13 = vadd.f32 %v1414_v11, %v561_v8  ;;  %v684_v14 = vpop.f32.mrb[17].mxu0 }
 0x2c8   :  { %v685_v15 = vadd.f32 %v684_v14, %v556_v9 }
 0x2c9   :  { %v724_v16 = vmax.f32 %v690_v13, 0.0 }
 0x2ca   :  { %v723_v17 = vmax.f32 %v685_v15, 0.0  ;;  %v1417_v18 = vpop.f32.mrb[18].mxu0 }
 0x2cb   :  { %v700_v19 = vadd.f32 %v1417_v18, %v571_v10  ;;  %v694_v20 = vpop.f32.mrb[19].mxu0  ;;  %v796_v10 = vpop.permute.xlu0 %795 }
 0x2cc   :  { %v1560_v22 = vpack.c.bf16 %v724_v16, %v723_v17  ;;  %v695_v23 = vadd.f32 %v694_v20, %v566_v12  ;;  %v811_v20 = vpop.permute.xlu1 %810 }
 0x2cd   :  { %v726_v25 = vmax.f32 %v700_v19, 0.0 }
 0x2ce   :  { %v725_v26 = vmax.f32 %v695_v23, 0.0  ;;  %v1420_v27 = vpop.f32.mrb[20].mxu0  ;;  %1561 = vmatprep.subr.bf16.mxu1 %v1560_v22 }
 0x2cf   :  { %v710_v28 = vadd.f32 %v1420_v27, %v581_v21  ;;  %v704_v29 = vpop.f32.mrb[21].mxu0  ;;  %1563 = vmatpush3.bf16.msra.mxu1 %v1560_v22  ;;  %v806_v23 = vpop.permute.xlu0 %805 }
 0x2d0   :  { %v1564_v30 = vpack.c.bf16 %v726_v25, %v725_v26  ;;  %v705_v31 = vadd.f32 %v704_v29, %v576_v24 }
 0x2d1   :  { %v728_v32 = vmax.f32 %v710_v28, 0.0 }
 0x2d2   :  { %v727_v34 = vmax.f32 %v705_v31, 0.0  ;;  %v1423_v35 = vpop.f32.mrb[22].mxu0  ;;  %1565 = vmatprep.subr.bf16.mxu1 %v1564_v30 }
 0x2d3   :  { %v720_v37 = vadd.f32 %v1423_v35, %v591_v33  ;;  %v714_v38 = vpop.f32.mrb[23].mxu0  ;;  %1567 = vmatpush3.bf16.msra.mxu1 %v1564_v30  ;;  %v816_v35 = vpop.permute.xlu0 %815 }
 0x2d4   :  { %v1568_v39 = vpack.c.bf16 %v728_v32, %v727_v34  ;;  %v715_v40 = vadd.f32 %v714_v38, %v586_v36  ;;  %v821_v32 = vpop.permute.xlu1 %820 }
 0x2d5   :  { %v730_v41 = vmax.f32 %v720_v37, 0.0 }
 0x2d6   :  { %v729_v42 = vmax.f32 %v715_v40, 0.0  ;;  %1569 = vmatprep.subr.bf16.mxu1 %v1568_v39 }
 0x2d7   :  { %1571 = vmatpush3.bf16.msra.mxu1 %v1568_v39 }
 0x2d8   :  { %v1572_v43 = vpack.c.bf16 %v730_v41, %v729_v42 }
 0x2da   :  { %1573 = vmatprep.subr.bf16.mxu1 %v1572_v43 }
 0x2db   :  { %1575 = vmatpush3.bf16.msra.mxu1 %v1572_v43 }
 0x2de   :  { %1441 = vmatmul.mubr.msk.f32.vlgmr.msra.gmra.mrb[8].mxu1 %vm593_vm4, %v732_v44 }
 0x2df   :  { %1443 = vmatprep.mubr.msk.f32.mxu1 %vm593_vm4, %v733_v45  ;;  %v831_v45 = vpop.permute.xlu1 %830 }
 0x2e2   :  { %1444 = vmatmul.mubr.msk.f32.gmra.mrb[10].mxu1 %vm593_vm4, %v734_v46 }
 0x2e3   :  { %1446 = vmatprep.mubr.msk.f32.mxu1 %vm593_vm4, %v735_v47 }
 0x2e6   :  { %1447 = vmatmul.mubr.msk.f32.gmra.mrb[12].mxu1 %vm593_vm4, %v736_v48  ;;  %v826_v48 = vpop.permute.xlu0 %825 }
 0x2e7   :  { %1449 = vmatprep.mubr.msk.f32.mxu1 %vm593_vm4, %v737_v49 }
 0x2ea   :  { %1450 = vmatmul.mubr.msk.f32.gmra.mrb[14].mxu1 %vm593_vm4, %v738_v50 }
 0x2eb   :  { %1452 = vmatprep.mubr.msk.f32.mxu1 %vm593_vm4, %v739_v51 }
 0x2ee   :  { %1453 = vmatmul.mubr.msk.f32.gmra.mrb[16].mxu1 %vm593_vm4, %v740_v52 }
 0x2ef   :  { %1455 = vmatprep.mubr.msk.f32.mxu1 %vm593_vm4, %v741_v53 }
 0x2f2   :  { %1456 = vmatmul.mubr.msk.f32.gmra.mrb[18].mxu1 %vm593_vm4, %v742_v54 }
 0x2f3   :  { %1458 = vmatprep.mubr.msk.f32.mxu1 %vm593_vm4, %v743_v55 }
 0x2f6   :  { %1459 = vmatmul.mubr.msk.f32.gmra.mrb[20].mxu1 %vm593_vm4, %v744_v56 }
 0x2f7   :  { %1461 = vmatprep.mubr.msk.f32.mxu1 %vm593_vm4, %v745_v57  ;;  %v841_v57 = vpop.permute.xlu1 %840 }
 0x2fa   :  { %1462 = vmatmul.mubr.msk.f32.gmra.mrb[22].mxu1 %vm593_vm4, %v746_v58 }
 0x3b1   :  { %v1442_v2 = vpop.f32.mrb[8].mxu1 }
 0x3b2   :  { %v963_v3 = vadd.f32 %v1442_v2, %v771_v60  ;;  %v957_v4 = vpop.f32.mrb[9].mxu1  ;;  %v836_v60 = vpop.permute.xlu0 %835 }
 0x3b3   :  { %v958_v5 = vadd.f32 %v957_v4, %v766_v61  ;;  %v1053_v4 = vld [vmem:[%s2060_s9 + $0x8] sm:$0xff] }
 0x3b4   :  { %v1037_v6 = vmax.f32 %v963_v3, 0.0 }
 0x3b5   :  { %v1036_v8 = vmax.f32 %v958_v5, 0.0  ;;  %v1445_v9 = vpop.f32.mrb[10].mxu1  ;;  %v1054_v5 = vld [vmem:[%s2060_s9 + $0x10] sm:$0xff] }
 0x3b6   :  { %v973_v11 = vadd.f32 %v1445_v9, %v781_v62  ;;  %v967_v12 = vpop.f32.mrb[11].mxu1 }
 0x3b7   :  { %v1576_v13 = vpack.c.bf16 %v1037_v6, %v1036_v8  ;;  %v968_v14 = vadd.f32 %v967_v12, %v776_v63  ;;  %v1055_v6 = vld [vmem:[%s2060_s9 + $0x18] sm:$0x3f]  ;;  %v1063_v8 = vpop.permute.xlu0 %1062 }
 0x3b8   :  { %v1039_v15 = vmax.f32 %v973_v11, 0.0 }
 0x3b9   :  { %v1038_v16 = vmax.f32 %v968_v14, 0.0  ;;  %v1448_v17 = vpop.f32.mrb[12].mxu1  ;;  %1577 = vmatprep.subr.bf16.mxu0 %v1576_v13 }
 0x3ba   :  { %v983_v18 = vadd.f32 %v1448_v17, %v791_v0  ;;  %v977_v19 = vpop.f32.mrb[13].mxu1  ;;  %1579 = vmatpush3.bf16.msra.mxu0 %v1576_v13 }
 0x3bb   :  { %v1580_v21 = vpack.c.bf16 %v1039_v15, %v1038_v16  ;;  %v978_v22 = vadd.f32 %v977_v19, %v786_v1  ;;  %v1073_v15 = vpop.permute.xlu0 %1072 }
 0x3bc   :  { %v1041_v24 = vmax.f32 %v983_v18, 0.0 }
 0x3bd   :  { %v1040_v25 = vmax.f32 %v978_v22, 0.0  ;;  %v1451_v26 = vpop.f32.mrb[14].mxu1  ;;  %1581 = vmatprep.subr.bf16.mxu0 %v1580_v21 }
 0x3be   :  { %v993_v27 = vadd.f32 %v1451_v26, %v801_v7  ;;  %v987_v28 = vpop.f32.mrb[15].mxu1  ;;  %1583 = vmatpush3.bf16.msra.mxu0 %v1580_v21  ;;  %v1068_v7 = vpop.permute.xlu1 %1067 }
 0x3bf   :  { %v1584_v29 = vpack.c.bf16 %v1041_v24, %v1040_v25  ;;  %v988_v30 = vadd.f32 %v987_v28, %v796_v10 }
 0x3c0   :  { %v1043_v31 = vmax.f32 %v993_v27, 0.0 }
 0x3c1   :  { %v1042_v33 = vmax.f32 %v988_v30, 0.0  ;;  %v1454_v34 = vpop.f32.mrb[16].mxu1  ;;  %1585 = vmatprep.subr.bf16.mxu0 %v1584_v29 }
 0x3c2   :  { %v1003_v36 = vadd.f32 %v1454_v34, %v811_v20  ;;  %v997_v37 = vpop.f32.mrb[17].mxu1  ;;  %1587 = vmatpush3.bf16.msra.mxu0 %v1584_v29  ;;  %v1078_v13 = vpop.permute.xlu1 %1077 }
 0x3c3   :  { %v1588_v38 = vpack.c.bf16 %v1043_v31, %v1042_v33  ;;  %v998_v39 = vadd.f32 %v997_v37, %v806_v23 }
 0x3c4   :  { %v1045_v40 = vmax.f32 %v1003_v36, 0.0 }
 0x3c5   :  { %v1044_v41 = vmax.f32 %v998_v39, 0.0  ;;  %v1457_v42 = vpop.f32.mrb[18].mxu1  ;;  %1589 = vmatprep.subr.bf16.mxu0 %v1588_v38 }
 0x3c6   :  { %v1013_v43 = vadd.f32 %v1457_v42, %v821_v32  ;;  %v1007_v44 = vpop.f32.mrb[19].mxu1  ;;  %1591 = vmatpush3.bf16.msra.mxu0 %v1588_v38 }
 0x3c7   :  { %v1592_v46 = vpack.c.bf16 %v1045_v40, %v1044_v41  ;;  %v1008_v47 = vadd.f32 %v1007_v44, %v816_v35 }
 0x3c8   :  { %v1047_v49 = vmax.f32 %v1013_v43, 0.0 }
 0x3c9   :  { %v1046_v50 = vmax.f32 %v1008_v47, 0.0  ;;  %v1460_v51 = vpop.f32.mrb[20].mxu1  ;;  %1593 = vmatprep.subr.bf16.mxu0 %v1592_v46 }
 0x3ca   :  { %v1023_v52 = vadd.f32 %v1460_v51, %v831_v45  ;;  %v1017_v53 = vpop.f32.mrb[21].mxu1  ;;  %1595 = vmatpush3.bf16.msra.mxu0 %v1592_v46 }
 0x3cb   :  { %v1596_v54 = vpack.c.bf16 %v1047_v49, %v1046_v50  ;;  %v1018_v55 = vadd.f32 %v1017_v53, %v826_v48 }
 0x3cc   :  { %v1049_v56 = vmax.f32 %v1023_v52, 0.0 }
 0x3cd   :  { %v1048_v58 = vmax.f32 %v1018_v55, 0.0  ;;  %v1463_v59 = vpop.f32.mrb[22].mxu1  ;;  %1597 = vmatprep.subr.bf16.mxu0 %v1596_v54 }
 0x3ce   :  { %v1033_v61 = vadd.f32 %v1463_v59, %v841_v57  ;;  %v1027_v62 = vpop.f32.mrb[23].mxu1  ;;  %1599 = vmatpush3.bf16.msra.mxu0 %v1596_v54 }
 0x3cf   :  { %v1600_v63 = vpack.c.bf16 %v1049_v56, %v1048_v58  ;;  %v1028_v0 = vadd.f32 %v1027_v62, %v836_v60 }
 0x3d0   :  { %v1051_v1 = vmax.f32 %v1033_v61, 0.0 }
 0x3d1   :  { %v1050_v2 = vmax.f32 %v1028_v0, 0.0  ;;  %1601 = vmatprep.subr.bf16.mxu0 %v1600_v63 }
 0x3d2   :  { %1603 = vmatpush3.bf16.msra.mxu0 %v1600_v63 }
 0x3d3   :  { %v1604_v3 = vpack.c.bf16 %v1051_v1, %v1050_v2 }
 0x3d5   :  { %1605 = vmatprep.subr.bf16.mxu0 %v1604_v3 }
 0x3d6   :  { %1607 = vmatpush3.bf16.msra.mxu0 %v1604_v3 }
 0x3d9   :  { %1497 = vmatmul.mubr.f32.vlgmr.msra.gmra.mrb[24].mxu0 %v1053_v4 }
 0x3da   :  { %1499 = vmatprep.mubr.f32.mxu0 %v1054_v5 }
 0x3dd   :  { %1500 = vmatmul.mubr.f32.gmra.mrb[26].mxu0 %v1055_v6 }
 0x4ac   :  { %v1498_v9 = vpop.f32.mrb[24].mxu0 }
 0x4ad   :  { %v1152_v10 = vadd.f32 %v1498_v9, %v1068_v7  ;;  %v1146_v11 = vpop.f32.mrb[25].mxu0 }
 0x4ae   :  { %v1147_v12 = vadd.f32 %v1146_v11, %v1063_v8 }
 0x4af   :  { %1167 = vst.msk [vmem:[%s2061_s11 + $0x8] sm:$0xff] %vm1165_vm5, %v1152_v10 }
 0x4b0   :  { %1166 = vst.msk [vmem:[%s2061_s11] sm:$0xff] %vm1165_vm5, %v1147_v12  ;;  %v1501_v14 = vpop.f32.mrb[26].mxu0 }
 0x4b1   :  { %v1162_v16 = vadd.f32 %v1501_v14, %v1078_v13  ;;  %v1156_v17 = vpop.f32.mrb[27].mxu0 }
 0x4b2   :  { %v1157_v18 = vadd.f32 %v1156_v17, %v1073_v15 }
 0x4b3   :  { %1170 = vst.msk [vmem:[%s2061_s11 + $0x18] sm:$0x3f] %vm1169_vm6, %v1162_v16 }
 0x4b4   :  { %1168 = vst.msk [vmem:[%s2061_s11 + $0x10] sm:$0xff] %vm1165_vm5, %v1157_v18 }

</bundles_post_ra>
